<compile_context>
chip_gen: v6e
topology: v6e:2x2x1
jax: 0.10.0
libtpu: 0.0.40
codegen_flags: <defaults>
</compile_context>

<pallas_src>
import functools
import math

import jax
import jax.numpy as jnp
from jax.experimental import pallas as pl
from jax.experimental.pallas import tpu as pltpu


def _cdiv(a, b):
    return -(-a // b)


def _crop_kernel(x_ref, o_ref, *, offsets):
    # `offsets` are static python ints -> static slices, zero runtime index math.
    idx = tuple(slice(off, off + size) for off, size in zip(offsets, o_ref.shape))
    o_ref[...] = x_ref[idx]


def crop_pallas(x, crop, *, max_block_bytes=2 * 1024 * 1024, min_grid_steps=8):
    """Pallas equivalent of Crop.forward: crop the last len(crop) dims of `x`
    by crop[i] elements on *each* side (crop[i] == 0 => no crop on that dim)."""
    crop = tuple(int(c) for c in crop)
    nd = x.ndim
    assert 1 <= len(crop) <= nd, "crop sequence longer than tensor rank"

    if nd == 1:
        # Lift to 2-D so the last-two-dims block rules are trivially satisfied.
        return crop_pallas(x[None], crop, max_block_bytes=max_block_bytes)[0]

    full_crop = (0,) * (nd - len(crop)) + crop
    in_shape = tuple(int(d) for d in x.shape)
    out_shape = tuple(d - 2 * c for d, c in zip(in_shape, full_crop))
    assert all(c >= 0 for c in full_crop) and all(d > 0 for d in out_shape), (
        "crop too large for input", in_shape, crop)

    itemsize = x.dtype.itemsize
    # Native sublane tile height for this dtype (f32: 8, bf16: 16, int8: 32).
    sub = max(8, 32 // max(itemsize, 1))

    H_ax, W_ax = nd - 2, nd - 1
    H_in, W_in = in_shape[H_ax], in_shape[W_ax]
    H_out, W_out = out_shape[H_ax], out_shape[W_ax]
    c_h, c_w = full_crop[H_ax], full_crop[W_ax]
    in_plane_bytes = H_in * W_in * itemsize

    lead_dims = tuple(range(nd - 2))
    n_lead = len(lead_dims)

    # --- H chunking: only when the H crop is zero (then input/output H blocks
    #     line up exactly and no margin rows are ever read). --------------------
    chunk_h = (c_h == 0) and (in_plane_bytes > max_block_bytes) and (H_in > sub)
    th = H_in
    n_h = 1
    if chunk_h:
        rows = max(sub, (max_block_bytes // max(W_in * itemsize, 1)) // sub * sub)
        th = min(rows, H_in)
        if th >= H_in:
            chunk_h = False
            th = H_in
        else:
            n_h = _cdiv(H_out, th)  # H_out == H_in here (c_h == 0)
    # TODO(synk): a plane with c_h != 0 that is far larger than VMEM falls back
    # to a full-plane block + raised vmem_limit; a pl.ANY + make_async_copy path
    # would lift that limit (and skip the H/W margin reads) entirely.

    # --- Leading-dim grouping: tiny planes -> move several leading indices per
    #     grid step, but keep >= min_grid_steps steps for v7x's two TCs. --------
    g_ax = nd - 3 if nd >= 3 else None
    group = (g_ax is not None and full_crop[g_ax] == 0 and not chunk_h
             and in_plane_bytes < max_block_bytes and out_shape[g_ax] > 1)
    tb = 1
    if group:
        tb = min(out_shape[g_ax], max(1, max_block_bytes // max(in_plane_bytes, 1)))
        other = math.prod(out_shape[d] for d in lead_dims if d != g_ax)
        if other < min_grid_steps:
            need = _cdiv(min_grid_steps, other)
            tb = min(tb, max(1, out_shape[g_ax] // need))
        if tb <= 1:
            group = False
            tb = 1

    # --- block shapes ----------------------------------------------------------
    in_block = [1] * nd
    out_block = [1] * nd
    if group:
        in_block[g_ax] = out_block[g_ax] = tb
    in_block[H_ax] = th if chunk_h else H_in
    out_block[H_ax] = th if chunk_h else H_out
    in_block[W_ax] = W_in
    out_block[W_ax] = W_out
    in_block = tuple(in_block)
    out_block = tuple(out_block)

    # --- grid (all axes parallel: every step writes a distinct output block) ---
    grid = []
    for d in lead_dims:
        grid.append(_cdiv(out_shape[d], tb) if (group and d == g_ax) else out_shape[d])
    if chunk_h:
        grid.append(n_h)
    if not grid:
        grid = [1]  # nd == 2, single step
    grid = tuple(grid)
    has_h_axis = chunk_h

    # Leading-dim crops folded into the index_map: block size 1 => block index
    # == element index, so `g + crop` is exact; a grouped dim has crop == 0.
    def in_index_map(*gs):
        idx = [gs[k] + full_crop[d] for k, d in enumerate(lead_dims)]
        idx.append(gs[n_lead] if has_h_axis else 0)
        idx.append(0)
        return tuple(idx)

    def out_index_map(*gs):
        idx = [gs[k] for k in range(n_lead)]
        idx.append(gs[n_lead] if has_h_axis else 0)
        idx.append(0)
        return tuple(idx)

    # Only the H/W crops remain as static in-kernel slices.
    offsets = [0] * nd
    if not chunk_h:
        offsets[H_ax] = c_h
    offsets[W_ax] = c_w
    kernel = functools.partial(_crop_kernel, offsets=tuple(offsets))

    # --- VMEM budget: 2x double-buffered (input + output) blocks + headroom. ---
    in_blk_bytes = math.prod(in_block) * itemsize
    out_blk_bytes = math.prod(out_block) * itemsize
    vmem_limit = 2 * (in_blk_bytes + out_blk_bytes) + 4 * 1024 * 1024
    vmem_limit = int(min(max(vmem_limit, 16 * 1024 * 1024), 64 * 1024 * 1024))

    # Advisory cost: only the leading-dim-cropped volume is read; full out written.
    bytes_read = math.prod(out_shape[:nd - 2]) * H_in * W_in * itemsize
    bytes_written = math.prod(out_shape) * itemsize

    return pl.pallas_call(
        kernel,
        out_shape=jax.ShapeDtypeStruct(out_shape, x.dtype),
        grid=grid,
        in_specs=[pl.BlockSpec(in_block, in_index_map)],
        out_specs=pl.BlockSpec(out_block, out_index_map),
        compiler_params=pltpu.CompilerParams(
            dimension_semantics=("parallel",) * len(grid),
            vmem_limit_bytes=vmem_limit),
        cost_estimate=pl.CostEstimate(
            flops=0, transcendentals=0,
            bytes_accessed=bytes_read + bytes_written),
    )(x)


if __name__ == "__main__":
    key = jax.random.PRNGKey(0)

    # 1) Standard NCHW spatial crop: (2,4,16,16), crop (2,3) -> (2,4,12,10).
    x = jax.random.normal(key, (2, 4, 16, 16), dtype=jnp.float32)
    out = jax.block_until_ready(crop_pallas(x, (2, 3)))
    ref = x[:, :, 2:-2, 3:-3]
    assert out.shape == ref.shape and jnp.array_equal(out, ref)

    # 2) Crop touching the channel dim plus a zero entry: crop (1,0,2).
    out2 = jax.block_until_ready(crop_pallas(x, (1, 0, 2)))
    ref2 = x[:, 1:-1, :, 2:-2]
    assert out2.shape == ref2.shape and jnp.array_equal(out2, ref2)

    # 3) Leading-dim grouping with a partial grouped block (C=9, tb=2).
    x3 = jax.random.normal(key, (2, 9, 16, 16), dtype=jnp.float32)
    out3 = jax.block_until_ready(crop_pallas(x3, (2, 2)))
    ref3 = x3[:, :, 2:-2, 2:-2]
    assert out3.shape == ref3.shape and jnp.array_equal(out3, ref3)

    # 4) H-chunking path (c_h == 0) with a partial last H block.
    x4 = jax.random.normal(key, (2, 200, 256), dtype=jnp.float32)
    out4 = jax.block_until_ready(crop_pallas(x4, (0, 4), max_block_bytes=128 * 1024))
    ref4 = x4[:, :, 4:-4]
    assert out4.shape == ref4.shape and jnp.array_equal(out4, ref4)

    # 5) Full-plane fallback when the sublane dim is cropped and the plane
    #    exceeds the block-byte target (vmem_limit covers it).
    x5 = jax.random.normal(key, (4, 256, 128), dtype=jnp.float32)
    out5 = jax.block_until_ready(crop_pallas(x5, (3, 5), max_block_bytes=64 * 1024))
    ref5 = x5[:, 3:-3, 5:-5]
    assert out5.shape == ref5.shape and jnp.array_equal(out5, ref5)

    # 6) Rank-2 input (previously a (8,128)-rule risk): (16,128), crop (2,8).
    x6 = jax.random.normal(key, (16, 128), dtype=jnp.float32)
    out6 = jax.block_until_ready(crop_pallas(x6, (2, 8)))
    ref6 = x6[2:-2, 8:-8]
    assert out6.shape == ref6.shape and jnp.array_equal(out6, ref6)

    print("KERNEL_OK")
</pallas_src>

<mosaic_0001>
module attributes {stable_mosaic.version = 11 : i64} {
  func.func @_crop_kernel(%arg0: i32, %arg1: i32, %arg2: memref<1x1x16x16xf32, #tpu.memory_space<vmem>>, %arg3: memref<1x1x12x10xf32, #tpu.memory_space<vmem>>) attributes {dimension_semantics = [#tpu.dimension_semantics<parallel>, #tpu.dimension_semantics<parallel>], iteration_bounds = array<i64: 2, 4>, scalar_prefetch = 0 : i64, scratch_operands = 0 : i64, tpu.core_type = #tpu.core_type<tc>, window_params = [{transform_indices = @transform_0, window_bounds = array<i64: 1, 1, 16, 16>}, {transform_indices = @transform_1, window_bounds = array<i64: 1, 1, 12, 10>}]} {
    %c0 = arith.constant 0 : index
    %c0_0 = arith.constant 0 : index
    %c2 = arith.constant 2 : index
    %c3 = arith.constant 3 : index
    %0 = vector.load %arg2[%c0, %c0_0, %c2, %c3] : memref<1x1x16x16xf32, #tpu.memory_space<vmem>>, vector<1x1x12x10xf32>
    %c0_1 = arith.constant 0 : index
    %c0_2 = arith.constant 0 : index
    %c0_3 = arith.constant 0 : index
    %c0_4 = arith.constant 0 : index
    %1 = vector.load %arg3[%c0_1, %c0_2, %c0_3, %c0_4] : memref<1x1x12x10xf32, #tpu.memory_space<vmem>>, vector<1x1x12x10xf32>
    tpu.vector_store %arg3[%c0_1, %c0_2, %c0_3, %c0_4], %0 {strides = array<i32>} : memref<1x1x12x10xf32, #tpu.memory_space<vmem>>, vector<1x1x12x10xf32>,
    return
  }
  func.func @transform_0(%arg0: i32, %arg1: i32) -> (i32, i32, i32, i32) {
    %c0_i32 = arith.constant 0 : i32
    %0 = arith.addi %arg0, %c0_i32 : i32
    %c0_i32_0 = arith.constant 0 : i32
    %1 = arith.addi %arg1, %c0_i32_0 : i32
    %c0_i32_1 = arith.constant 0 : i32
    %c0_i32_2 = arith.constant 0 : i32
    %c0_i32_3 = arith.constant 0 : i32
    return %0, %1, %c0_i32_1, %c0_i32_2 : i32, i32, i32, i32
  }
  func.func @transform_1(%arg0: i32, %arg1: i32) -> (i32, i32, i32, i32) {
    %c0_i32 = arith.constant 0 : i32
    %c0_i32_0 = arith.constant 0 : i32
    %c0_i32_1 = arith.constant 0 : i32
    return %arg0, %arg1, %c0_i32, %c0_i32_0 : i32, i32, i32, i32
  }
}

</mosaic_0001>

<bundles_post_ra>
// kernel: tpu_custom_call.1
= control target key start
LH: loop header
LB: loop body
LE: loop exit
PB: predicated region body
PF: predicated region fallthrough
CT: control target
= control target key end

     0   :  { %6 = vsyncpa [#allocation3], 0  ;;  %s602_s0 = inlined_call_operand.hbm [shape: f32[2,4,16,16], index: 0, kind: input, shape index: {}]   ;;  %s603_s1 = inlined_call_operand.vmem [shape: f32[2,4,12,10], index: 1, kind: output, shape index: {}]  }
   0x1   :  { %8 = vsyncpa [#allocation3 + $0x1], 0  ;;  %s477_s6 = smov 0   ;;  %s479_s7 = smov 0  }
   0x2   :  { %s481_s8 = smov 0   ;;  %s483_s9 = smov 0  }
   0x3   :  { %s485_s10 = smov 0   ;;  %s487_s11 = smov 0  }
   0x4   :  { %s489_s12 = smov 0   ;;  %s491_s13 = smov 0  }
   0x5 LB: > { %s278_s14 = sadd.s32 4294967295, %s461_s13   ;;  %s23_s15 = sadd.s32 1, %s453_s11  ;;  %s461_s13 = sphi %s491_s13, %s14_s13   ;;  %s457_s12 = sphi %s489_s12, %s613_s12   ;;  %s453_s11 = sphi %s487_s11, %s612_s11   ;;  %s449_s10 = sphi %s485_s10, %s611_s10   ;;  %s445_s9 = sphi %s483_s9, %s610_s9   ;;  %s441_s8 = sphi %s481_s8, %s609_s8   ;;  %s437_s7 = sphi %s479_s7, %s608_s7   ;;  %s433_s6 = sphi %s477_s6, %s607_s6  }
   0x6   : > { %p24_p0 = scmp.ge.s32.totalorder %s23_s15, 4  ;;  %s26_s16 = sadd.s32 1, %s457_s12 }
   0x7   : > { %s35_s17 = sadd.s32 1, %s441_s8  ;;  %p42_p1 = scmp.ne.s32.totalorder %s441_s8, %s437_s7 }
   0x8   : > { %s615_s15 = smov (%p24_p0, %s23_s15), 0  ;;  %s617_s16 = smov (!%p24_p0, %s26_s16), %s457_s12 }
   0x9   : > { %s31_s18 = ssub.s32 %s453_s11, %s615_s15  ;;  %p43_p2 = scmp.eq.s32.totalorder %s461_s13, 0 }
   0xa   : > { %p28_p3 = scmp.ge.s32.totalorder %s617_s16, 2  ;;  %p48_p4 = scmp.ne.s32.totalorder %s437_s7, %s433_s6 }
   0xb   : > { %p528_p5 = por %p43_p2, %p42_p1  ;;  %p49_p6 = scmp.eq.s32.totalorder %s278_s14, 0 }
   0xc   : > { %s619_s16 = smov (%p28_p3, %s617_s16), 0  ;;  %p299_p8 = scmp.lt.s32.totalorder %s461_s13, 8 }
   0xd   : > { %p534_p7 = por %p49_p6, %p48_p4  ;;  %s30_s21 = ssub.s32 %s457_s12, %s619_s16 }
   0xe   : > { %s32_s22 = sor.u32 %s31_s18, %s30_s21  ;;  %s100_s23 = sand.u32 1, %s441_s8  }
   0xf   : > { %p33_p9 = scmp.eq.s32.totalorder %s32_s22, 0  ;;  %s282_s24 = sshll.u32 %s100_s23, 4 }
  0x10   : > { %s283_s25 = sshll.u32 %s453_s11, 1  ;;  %s284_s27 = sshll.u32 %s457_s12, 3 }
  0x11   : > { %s544_s26 = scalar_select %p33_p9, %s441_s8, %s35_s17  }
  0x12   : > { %s110_s28 = sadd.s32 %s284_s27, %s283_s25  ;;  %s104_s29 = scalar_lea.vmem [#allocation2], %s282_s24 }
  0x13   : > { %s113_s30 = sshll.u32 %s104_s29, 4  ;;  %s285_s2 = sshll.u32 %s110_s28, 7  ;;  %s114_s30 = int_to_ptr.vmem [resolvable:$true] %s113_s30 }
  0x14   : > { %s112_s5 = scalar_lea.hbm %s602_s0, %s285_s2  ;;  %p554_p10 = pnand %p299_p8, %p528_p5 }
  0x15   : > { %p286_p11 = scmp.ge.s32.totalorder %s461_s13, 1  ;;  %s101_s14 = scalar_lea.sflag [#allocation3], %s100_s23 }
  0x16   : > { %p369_p12 = pneg %p554_p10  ;;  %s380_s17 = scalar_lea.vmem %s114_s30, 256 }
  0x17   : > { %p381_p13 = scmp.ne.s32.totalorder %s114_s30, %s380_s17  ;;  %s463_s18 = smov [#allocation2]  }
  0x18   : > { %s385_s21 = sshll.u32 %s463_s18, 4  ;;  %s386_s21 = int_to_ptr.vmem [resolvable:$false] %s385_s21 }
  0x19   : > { %p383_p0 = pnand %p381_p13, %p369_p12  ;;  %s387_s22 = scalar_lea.vmem %s386_s21, 512 }
  0x1a   : > { %p388_p2 = scmp.lt.s32.totalorder %s114_s30, %s386_s21  ;;  %p389_p3 = scmp.lt.s32.totalorder %s387_s22, %s380_s17 }
  0x1b   : > { %p384_p1 = pneg %p383_p0 }
  0x1c   : > { %p390_p4 = por %p389_p3, %p388_p2 }
  0x1e   : > { %p391_p5 = pnand %p390_p4, %p384_p1 }
  0x20   : > { %394 = shalt.err (!%p391_p5)
}
  0x21   : > { %s464_s19 = smov 128   ;;  %s465_s23 = smov 8  }
  0x22   : > { %298 = dma.hbm_to_vmem [thread:$0]  (!%p554_p10), %s112_s5, 256, %s114_s30, %s101_s14, %s464_s19, %s464_s19, %s465_s23  }
  0x23   : > { %p121_p6 = scmp.lt.s32.totalorder %s461_s13, 9 }
  0x25   : > { %p122_p8 = pnand %p286_p11, %p121_p6 }
  0x26   : > { %s127_s24 = sand.u32 (!%p122_p8), 1, %s437_s7  }
  0x27   : > { %125 = sbr.rel (%p122_p8) target bundleno = 166 (0xa6), region = 24  ;;  %s287_s25 = sshll.u32 (!%p122_p8), %s127_s24, 4 }
  0x28   : > { %s128_s27 = scalar_lea.sflag (!%p122_p8), [#allocation3], %s127_s24  ;;  %s131_s28 = scalar_lea.vmem (!%p122_p8), [#allocation2], %s287_s25 }
  0x2c   : > { %428 = dma.done.wait (%p534_p7), %s128_s27, 256  }
  0x2d   : > { %430 = vsyncadd (%p534_p7), %s128_s27, 4294967040  ;;  %v163_v0 = vld [vmem:[%s131_s28 + $0x2] sm:$0xff]  ;;  %s466_s29 = smov 125   ;;  %v164_v1 = vld [vmem:[%s131_s28 + $0xa] sm:$0xf]  ;;  %p154_p9 = scmp.lt.s32.totalorder %s449_s10, 1 }
  0x2e   : > { %167 = vrot.lane.b32.xlu0 %v163_v0, %s466_s29  ;;  %p156_p10 = scmp.lt.s32.totalorder %s445_s9, 3  ;;  %vm173_vm0 = vcmask 80896   ;;  %vm175_vm1 = vcmask 76800  }
  0x2f   : > { %s621_s10 = smov (!%p154_p9, %s449_s10), 1 }
  0x30   : > { %s623_s9 = smov (!%p156_p10, %s445_s9), 3  ;;  %s289_s2 = sshll.u32 %s621_s10, 3 }
  0x31   : > { %s288_s30 = sshll.u32 %s623_s9, 1 }
  0x32   : > { %169 = vrot.lane.b32.xlu0 %v164_v1, %s466_s29  ;;  %s160_s3 = sadd.s32 %s289_s2, %s288_s30 }
  0x33   : > { %s290_s4 = sshll.u32 %s160_s3, 3 }
  0x34   : > { %s162_s6 = scalar_lea.vmem %s603_s1, %s290_s4 }
  0xa0   : > { %v168_v2 = vpop.permute.xlu0 %167 }
  0xa1   : > { %174 = vst.msk [vmem:[%s162_s6] sm:$0xff] %vm173_vm0, %v168_v2 }
  0xa4   : > { %v170_v3 = vpop.permute.xlu0 %169 }
  0xa5   : > { %176 = vst.msk [vmem:[%s162_s6 + $0x8] sm:$0xf] %vm175_vm1, %v170_v3 }
  0xa6 PF: > { %s14_s13 = sadd.s32 1, %s461_s13   ;;  %s607_s6 = smov %s437_s7 }
  0xa7   : > { %p11_p7 = scmp.ge.s32.totalorder %s14_s13, 10   ;;  %s608_s7 = smov %s441_s8 }
  0xa8   : > { %s609_s8 = smov %s544_s26  ;;  %s610_s9 = smov %s453_s11 }
  0xa9   : > { %s611_s10 = smov %s457_s12  ;;  %s612_s11 = smov %s615_s15 }
  0xaa   : > { %s613_s12 = smov %s619_s16  ;;  %13 = sbr.rel (!%p11_p7) target bundleno = 5 (0x5), region = 64 }
  0xaf   :  { %206 = vsyncpa [#allocation3], 1 }
  0xb0   :  { %208 = vsyncpa [#allocation3 + $0x1], 1 }

</bundles_post_ra>
